<compile_context>
chip_gen: v7x
topology: tpu7x:2x2x1
jax: 0.10.0
libtpu: 0.0.40
codegen_flags: <defaults>
</compile_context>

<pallas_src>
import numpy as np
import jax
import jax.numpy as jnp
from jax.experimental import pallas as pl
from jax.experimental.pallas import tpu as pltpu


def _visual_sa_kernel(local_ref, rawg_ref,
                      wl_ref, bl_ref, scale_l_ref, shift_l_ref,
                      wg_ref, bg_ref, scale_g_ref, shift_g_ref,
                      wc_ref, bc_ref, sel_ref, selT_ref, out_ref):
    # local_ref : (BT*R, E) f32        rawg_ref : (BT, E) f32
    # wl_ref/wg_ref: (E, E) resident weights (f32 or bf16)
    # bl/bg/scale_g/shift_g/wc: (1, E)  scale_l/shift_l: (BT*R, 1)  bc: (1, 1)
    # sel_ref : (BT, BT*R)  block-diagonal ones (region rows -> batch segment sum)
    # selT_ref: (BT*R, BT)  its transpose (batch -> region broadcast / masking)
    local = local_ref[...]          # original f32 regions (reused for the weighted sum)
    rawg = rawg_ref[...]
    sel = sel_ref[...]
    selT = selT_ref[...]
    cdt = wl_ref.dtype              # MXU operand dtype (f32 or bf16)

    # --- local branch: Linear -> folded per-region BN -> Tanh (Dropout = identity, eval)
    l_lin = jnp.dot(local.astype(cdt), wl_ref[...],
                    preferred_element_type=jnp.float32) + bl_ref[...]             # (BT*R, E)
    l_emb = jnp.tanh(l_lin * scale_l_ref[...] + shift_l_ref[...])                 # (BT*R, E)

    # --- global branch: Linear -> folded BN -> Tanh
    g_lin = jnp.dot(rawg.astype(cdt), wg_ref[...],
                    preferred_element_type=jnp.float32) + bg_ref[...]             # (BT, E)
    g_emb = jnp.tanh(g_lin * scale_g_ref[...] + shift_g_ref[...])                 # (BT, E)

    # replicate each batch's g_emb across its R region rows (small MXU matmul).
    g_rep = jnp.dot(selT, g_emb, preferred_element_type=jnp.float32)              # (BT*R, E)

    # --- attention scores (Linear E -> 1) per region row
    common = l_emb * g_rep                                                         # (BT*R, E)
    scores = jnp.sum(common * wc_ref[...], axis=-1, keepdims=True) + bc_ref[...]  # (BT*R, 1)

    # --- segmented (per-batch) softmax over region rows, via the selection mask
    neg = jnp.float32(-1e30)
    masked = jnp.where(selT > 0.5, scores, neg)                                   # (BT*R, BT)
    g_max = jnp.max(masked, axis=0, keepdims=True)                                # (1, BT)
    m_col = jnp.sum(selT * g_max, axis=-1, keepdims=True)                         # (BT*R, 1)
    e_col = jnp.exp(scores - m_col)                                               # (BT*R, 1)
    g_sum = jnp.sum(e_col * selT, axis=0, keepdims=True)                          # (1, BT)
    d_col = jnp.sum(selT * g_sum, axis=-1, keepdims=True)                         # (BT*R, 1)
    w_col = e_col / d_col                                                          # (BT*R, 1)

    # --- weighted sum of the ORIGINAL regions (segment sum as a tiny MXU matmul)
    weighted = w_col * local                                                       # (BT*R, E)
    new_g = jnp.dot(sel, weighted, preferred_element_type=jnp.float32)             # (BT, E)

    # --- l2 normalization
    norm = jnp.sqrt(jnp.sum(new_g * new_g, axis=-1, keepdims=True)) + 1e-8
    out_ref[...] = (new_g / norm).astype(out_ref.dtype)


def visual_sa_forward(local, raw_global, params, *, bn_eps=1e-5,
                      use_bf16_matmul=False, batch_tile=8):
    """local: (B, R, E) f32, raw_global: (B, E) f32 -> (B, E) f32."""
    B, R, E = local.shape
    assert raw_global.shape == (B, E)

    # Batch tile: pack several batch rows per grid step so the (BT*R, E) matmul has
    # enough M rows to amortize MXU weight loads and per-step pipeline overhead.
    if B <= batch_tile:
        bt = B
        b_pad = B
    else:
        bt = batch_tile
        assert bt % 8 == 0, "batch_tile must be a multiple of 8 when B > batch_tile"
        b_pad = ((B + bt - 1) // bt) * bt
    grid = b_pad // bt

    if b_pad != B:
        local = jnp.pad(local, ((0, b_pad - B), (0, 0), (0, 0)))
        raw_global = jnp.pad(raw_global, ((0, b_pad - B), (0, 0)))

    local_flat = local.reshape(b_pad * R, E)

    # Fold BatchNorm (inference / running stats) into per-channel scale & shift.
    scale_l = params["bn_l_gamma"] * jax.lax.rsqrt(params["bn_l_var"] + bn_eps)
    shift_l = params["bn_l_beta"] - params["bn_l_mean"] * scale_l
    scale_g = params["bn_g_gamma"] * jax.lax.rsqrt(params["bn_g_var"] + bn_eps)
    shift_g = params["bn_g_beta"] - params["bn_g_mean"] * scale_g

    wl_t = params["wl_t"]
    wg_t = params["wg_t"]
    wbytes = 4
    if use_bf16_matmul:
        # bf16 operands into the MXU (f32 accumulation in-kernel); halves weight VMEM/DMA.
        wl_t = wl_t.astype(jnp.bfloat16)
        wg_t = wg_t.astype(jnp.bfloat16)
        wbytes = 2

    bl2 = params["bl"].reshape(1, E)
    bg2 = params["bg"].reshape(1, E)
    sl2 = jnp.tile(scale_l.reshape(R, 1).astype(jnp.float32), (bt, 1))   # (bt*R, 1)
    tl2 = jnp.tile(shift_l.reshape(R, 1).astype(jnp.float32), (bt, 1))   # (bt*R, 1)
    sg2 = scale_g.reshape(1, E).astype(jnp.float32)
    tg2 = shift_g.reshape(1, E).astype(jnp.float32)
    wc2 = params["wc"].reshape(1, E)
    bc2 = params["bc"].reshape(1, 1)

    # Block-diagonal 0/1 selection matrix (batch segment <-> region rows).
    sel_np = np.kron(np.eye(bt, dtype=np.float32), np.ones((1, R), dtype=np.float32))
    sel = jnp.asarray(sel_np)            # (bt, bt*R)
    selT = jnp.asarray(sel_np.T)         # (bt*R, bt)

    # Advisory cost hint for XLA scheduling around the custom call.
    flops = int(2 * b_pad * (R + 1) * E * E      # the two linear projections
                + 2 * b_pad * R * E * bt         # g_rep replication matmul
                + 2 * b_pad * R * E              # segment-sum matmul
                + 12 * b_pad * R * E)            # elementwise / reductions
    transcendentals = int(b_pad * ((R + 1) * E + R))
    bytes_accessed = int(4 * (b_pad * R * E + 2 * b_pad * E)
                         + 2 * E * E * wbytes
                         + 4 * (6 * E + 2 * bt * R + 2 * bt * bt * R + 2))

    # Weights resident (single copy) + double-buffered per-batch-tile blocks + temps.
    vmem_limit = int(min(64 * 1024 * 1024,
                         max(16 * 1024 * 1024,
                             2 * 2 * E * E * wbytes      # both weights (+ headroom)
                             + 10 * 4 * bt * R * E        # local block (x2) + live temps
                             + 8 * 4 * bt * E
                             + 2 * 1024 * 1024)))

    out = pl.pallas_call(
        _visual_sa_kernel,
        out_shape=jax.ShapeDtypeStruct((b_pad, E), local.dtype),
        grid_spec=pltpu.PrefetchScalarGridSpec(
            num_scalar_prefetch=0,
            grid=(grid,),
            in_specs=[
                pl.BlockSpec((bt * R, E), lambda i: (i, 0)),   # local regions (flattened)
                pl.BlockSpec((bt, E), lambda i: (i, 0)),       # raw_global rows
                pl.BlockSpec((E, E), lambda i: (0, 0)),        # Wl^T (VMEM resident)
                pl.BlockSpec((1, E), lambda i: (0, 0)),        # b_l
                pl.BlockSpec((bt * R, 1), lambda i: (0, 0)),   # BN-local scale (tiled)
                pl.BlockSpec((bt * R, 1), lambda i: (0, 0)),   # BN-local shift (tiled)
                pl.BlockSpec((E, E), lambda i: (0, 0)),        # Wg^T (VMEM resident)
                pl.BlockSpec((1, E), lambda i: (0, 0)),        # b_g
                pl.BlockSpec((1, E), lambda i: (0, 0)),        # BN-global scale
                pl.BlockSpec((1, E), lambda i: (0, 0)),        # BN-global shift
                pl.BlockSpec((1, E), lambda i: (0, 0)),        # w_common
                pl.BlockSpec((1, 1), lambda i: (0, 0)),        # b_common
                pl.BlockSpec((bt, bt * R), lambda i: (0, 0)),  # selection matrix
                pl.BlockSpec((bt * R, bt), lambda i: (0, 0)),  # selection matrix (T)
            ],
            out_specs=pl.BlockSpec((bt, E), lambda i: (i, 0)),
        ),
        compiler_params=pltpu.CompilerParams(
            dimension_semantics=("parallel",),
            vmem_limit_bytes=vmem_limit),
        cost_estimate=pl.CostEstimate(flops=flops,
                                      transcendentals=transcendentals,
                                      bytes_accessed=bytes_accessed),
    )(local_flat, raw_global, wl_t, bl2, sl2, tl2, wg_t, bg2, sg2, tg2, wc2, bc2,
      sel, selT)
    return out[:B]


def init_visual_sa_params(key, embed_dim, num_region):
    """Mirror VisualSA.init_weights: Xavier-uniform Linear weights, zero biases,
    BatchNorm gamma=1 / beta=0 (fresh running stats: mean=0, var=1)."""
    k1, k2, k3 = jax.random.split(key, 3)
    r = np.sqrt(6.0) / np.sqrt(embed_dim + embed_dim)
    # PyTorch Linear weight is (out, in); we store the transpose (in, out).
    wl_t = jax.random.uniform(k1, (embed_dim, embed_dim), minval=-r, maxval=r,
                              dtype=jnp.float32)
    wg_t = jax.random.uniform(k2, (embed_dim, embed_dim), minval=-r, maxval=r,
                              dtype=jnp.float32)
    rc = np.sqrt(6.0) / np.sqrt(embed_dim + 1)
    wc = jax.random.uniform(k3, (embed_dim,), minval=-rc, maxval=rc, dtype=jnp.float32)
    return dict(
        wl_t=wl_t, bl=jnp.zeros((embed_dim,), jnp.float32),
        bn_l_gamma=jnp.ones((num_region,), jnp.float32),
        bn_l_beta=jnp.zeros((num_region,), jnp.float32),
        bn_l_mean=jnp.zeros((num_region,), jnp.float32),
        bn_l_var=jnp.ones((num_region,), jnp.float32),
        wg_t=wg_t, bg=jnp.zeros((embed_dim,), jnp.float32),
        bn_g_gamma=jnp.ones((embed_dim,), jnp.float32),
        bn_g_beta=jnp.zeros((embed_dim,), jnp.float32),
        bn_g_mean=jnp.zeros((embed_dim,), jnp.float32),
        bn_g_var=jnp.ones((embed_dim,), jnp.float32),
        wc=wc, bc=jnp.zeros((), jnp.float32),
    )


def _reference(local, raw_global, params, bn_eps=1e-5):
    scale_l = params["bn_l_gamma"] / jnp.sqrt(params["bn_l_var"] + bn_eps)
    shift_l = params["bn_l_beta"] - params["bn_l_mean"] * scale_l
    scale_g = params["bn_g_gamma"] / jnp.sqrt(params["bn_g_var"] + bn_eps)
    shift_g = params["bn_g_beta"] - params["bn_g_mean"] * scale_g

    l_lin = jnp.einsum("bre,ef->brf", local, params["wl_t"]) + params["bl"]
    l_emb = jnp.tanh(l_lin * scale_l[None, :, None] + shift_l[None, :, None])

    g_lin = raw_global @ params["wg_t"] + params["bg"]
    g_emb = jnp.tanh(g_lin * scale_g + shift_g)

    common = l_emb * g_emb[:, None, :]
    scores = jnp.einsum("bre,e->br", common, params["wc"]) + params["bc"]
    w = jax.nn.softmax(scores, axis=1)
    new_global = jnp.einsum("br,bre->be", w, local)
    norm = jnp.sqrt(jnp.sum(new_global * new_global, axis=-1, keepdims=True)) + 1e-8
    return new_global / norm


if __name__ == "__main__":
    key = jax.random.PRNGKey(0)
    k_loc, k_par = jax.random.split(key)

    # Small shapes consistent with (batch, regions, embed): production is (B, 36, 1024).
    B, R, E = 2, 8, 32
    local = jax.random.normal(k_loc, (B, R, E), dtype=jnp.float32)
    raw_global = jnp.mean(local, axis=1)          # "raw image by averaging regions"
    params = init_visual_sa_params(k_par, E, R)

    ref = _reference(local, raw_global, params)

    # f32 path.
    out = visual_sa_forward(local, raw_global, params)
    out = jax.block_until_ready(out)
    np.testing.assert_allclose(np.asarray(out), np.asarray(ref), rtol=1e-4, atol=1e-4)
    assert out.shape == (B, E)

    # bf16-operand MXU path (production option for v6e/v7x): looser tolerance.
    out_bf16 = visual_sa_forward(local, raw_global, params, use_bf16_matmul=True)
    out_bf16 = jax.block_until_ready(out_bf16)
    np.testing.assert_allclose(np.asarray(out_bf16), np.asarray(ref), rtol=5e-2, atol=5e-2)

    print("KERNEL_OK")
</pallas_src>

<mosaic_0001>
module attributes {stable_mosaic.version = 11 : i64} {
  func.func @_visual_sa_kernel(%arg0: i32, %arg1: memref<16x32xf32, #tpu.memory_space<vmem>>, %arg2: memref<2x32xf32, #tpu.memory_space<vmem>>, %arg3: memref<32x32xf32, #tpu.memory_space<vmem>>, %arg4: memref<1x32xf32, #tpu.memory_space<vmem>>, %arg5: memref<16x1xf32, #tpu.memory_space<vmem>>, %arg6: memref<16x1xf32, #tpu.memory_space<vmem>>, %arg7: memref<32x32xf32, #tpu.memory_space<vmem>>, %arg8: memref<1x32xf32, #tpu.memory_space<vmem>>, %arg9: memref<1x32xf32, #tpu.memory_space<vmem>>, %arg10: memref<1x32xf32, #tpu.memory_space<vmem>>, %arg11: memref<1x32xf32, #tpu.memory_space<vmem>>, %arg12: memref<1x1xf32, #tpu.memory_space<vmem>>, %arg13: memref<2x16xf32, #tpu.memory_space<vmem>>, %arg14: memref<16x2xf32, #tpu.memory_space<vmem>>, %arg15: memref<2x32xf32, #tpu.memory_space<vmem>>) attributes {dimension_semantics = [#tpu.dimension_semantics<parallel>], iteration_bounds = array<i64: 1>, scalar_prefetch = 0 : i64, scratch_operands = 0 : i64, tpu.core_type = #tpu.core_type<tc>, window_params = [{transform_indices = @transform_0, window_bounds = array<i64: 16, 32>}, {transform_indices = @transform_1, window_bounds = array<i64: 2, 32>}, {pipeline_mode = #tpu.pipeline_mode<synchronous>, transform_indices = @transform_2, window_bounds = array<i64: 32, 32>}, {pipeline_mode = #tpu.pipeline_mode<synchronous>, transform_indices = @transform_3, window_bounds = array<i64: 1, 32>}, {pipeline_mode = #tpu.pipeline_mode<synchronous>, transform_indices = @transform_4, window_bounds = array<i64: 16, 1>}, {pipeline_mode = #tpu.pipeline_mode<synchronous>, transform_indices = @transform_5, window_bounds = array<i64: 16, 1>}, {pipeline_mode = #tpu.pipeline_mode<synchronous>, transform_indices = @transform_6, window_bounds = array<i64: 32, 32>}, {pipeline_mode = #tpu.pipeline_mode<synchronous>, transform_indices = @transform_7, window_bounds = array<i64: 1, 32>}, {pipeline_mode = #tpu.pipeline_mode<synchronous>, transform_indices = @transform_8, window_bounds = array<i64: 1, 32>}, {pipeline_mode = #tpu.pipeline_mode<synchronous>, transform_indices = @transform_9, window_bounds = array<i64: 1, 32>}, {pipeline_mode = #tpu.pipeline_mode<synchronous>, transform_indices = @transform_10, window_bounds = array<i64: 1, 32>}, {pipeline_mode = #tpu.pipeline_mode<synchronous>, transform_indices = @transform_11, window_bounds = array<i64: 1, 1>}, {pipeline_mode = #tpu.pipeline_mode<synchronous>, transform_indices = @transform_12, window_bounds = array<i64: 2, 16>}, {pipeline_mode = #tpu.pipeline_mode<synchronous>, transform_indices = @transform_13, window_bounds = array<i64: 16, 2>}, {transform_indices = @transform_14, window_bounds = array<i64: 2, 32>}]} {
    %c0 = arith.constant 0 : index
    %c0_0 = arith.constant 0 : index
    %0 = vector.load %arg1[%c0, %c0_0] : memref<16x32xf32, #tpu.memory_space<vmem>>, vector<16x32xf32>
    %c0_1 = arith.constant 0 : index
    %c0_2 = arith.constant 0 : index
    %1 = vector.load %arg2[%c0_1, %c0_2] : memref<2x32xf32, #tpu.memory_space<vmem>>, vector<2x32xf32>
    %c0_3 = arith.constant 0 : index
    %c0_4 = arith.constant 0 : index
    %2 = vector.load %arg13[%c0_3, %c0_4] : memref<2x16xf32, #tpu.memory_space<vmem>>, vector<2x16xf32>
    %c0_5 = arith.constant 0 : index
    %c0_6 = arith.constant 0 : index
    %3 = vector.load %arg14[%c0_5, %c0_6] : memref<16x2xf32, #tpu.memory_space<vmem>>, vector<16x2xf32>
    %c0_7 = arith.constant 0 : index
    %c0_8 = arith.constant 0 : index
    %4 = vector.load %arg3[%c0_7, %c0_8] : memref<32x32xf32, #tpu.memory_space<vmem>>, vector<32x32xf32>
    %cst = arith.constant dense<0.000000e+00> : vector<16x32xf32>
    %5 = tpu.matmul %0, %4, %cst {dimension_numbers = #tpu.dot_dimension_numbers<[1], [0], [0], [1], [0, 0, 1, 1], [], []>} : vector<16x32xf32>, vector<32x32xf32>, vector<16x32xf32> -> vector<16x32xf32>
    %c0_9 = arith.constant 0 : index
    %c0_10 = arith.constant 0 : index
    %6 = vector.load %arg4[%c0_9, %c0_10] : memref<1x32xf32, #tpu.memory_space<vmem>>, vector<1x32xf32>
    %7 = vector.broadcast %6 : vector<1x32xf32> to vector<16x32xf32>
    %8 = arith.addf %5, %7 : vector<16x32xf32>
    %c0_11 = arith.constant 0 : index
    %c0_12 = arith.constant 0 : index
    %9 = vector.load %arg5[%c0_11, %c0_12] : memref<16x1xf32, #tpu.memory_space<vmem>>, vector<16x1xf32>
    %10 = vector.broadcast %9 : vector<16x1xf32> to vector<16x32xf32>
    %11 = arith.mulf %8, %10 : vector<16x32xf32>
    %c0_13 = arith.constant 0 : index
    %c0_14 = arith.constant 0 : index
    %12 = vector.load %arg6[%c0_13, %c0_14] : memref<16x1xf32, #tpu.memory_space<vmem>>, vector<16x1xf32>
    %13 = vector.broadcast %12 : vector<16x1xf32> to vector<16x32xf32>
    %14 = arith.addf %11, %13 : vector<16x32xf32>
    %15 = math.tanh %14 : vector<16x32xf32>
    %c0_15 = arith.constant 0 : index
    %c0_16 = arith.constant 0 : index
    %16 = vector.load %arg7[%c0_15, %c0_16] : memref<32x32xf32, #tpu.memory_space<vmem>>, vector<32x32xf32>
    %cst_17 = arith.constant dense<0.000000e+00> : vector<2x32xf32>
    %17 = tpu.matmul %1, %16, %cst_17 {dimension_numbers = #tpu.dot_dimension_numbers<[1], [0], [0], [1], [0, 0, 1, 1], [], []>} : vector<2x32xf32>, vector<32x32xf32>, vector<2x32xf32> -> vector<2x32xf32>
    %c0_18 = arith.constant 0 : index
    %c0_19 = arith.constant 0 : index
    %18 = vector.load %arg8[%c0_18, %c0_19] : memref<1x32xf32, #tpu.memory_space<vmem>>, vector<1x32xf32>
    %19 = vector.broadcast %18 : vector<1x32xf32> to vector<2x32xf32>
    %20 = arith.addf %17, %19 : vector<2x32xf32>
    %c0_20 = arith.constant 0 : index
    %c0_21 = arith.constant 0 : index
    %21 = vector.load %arg9[%c0_20, %c0_21] : memref<1x32xf32, #tpu.memory_space<vmem>>, vector<1x32xf32>
    %22 = vector.broadcast %21 : vector<1x32xf32> to vector<2x32xf32>
    %23 = arith.mulf %20, %22 : vector<2x32xf32>
    %c0_22 = arith.constant 0 : index
    %c0_23 = arith.constant 0 : index
    %24 = vector.load %arg10[%c0_22, %c0_23] : memref<1x32xf32, #tpu.memory_space<vmem>>, vector<1x32xf32>
    %25 = vector.broadcast %24 : vector<1x32xf32> to vector<2x32xf32>
    %26 = arith.addf %23, %25 : vector<2x32xf32>
    %27 = math.tanh %26 : vector<2x32xf32>
    %cst_24 = arith.constant dense<0.000000e+00> : vector<16x32xf32>
    %28 = tpu.matmul %3, %27, %cst_24 {dimension_numbers = #tpu.dot_dimension_numbers<[1], [0], [0], [1], [0, 0, 1, 1], [], []>} : vector<16x2xf32>, vector<2x32xf32>, vector<16x32xf32> -> vector<16x32xf32>
    %29 = arith.mulf %15, %28 : vector<16x32xf32>
    %c0_25 = arith.constant 0 : index
    %c0_26 = arith.constant 0 : index
    %30 = vector.load %arg11[%c0_25, %c0_26] : memref<1x32xf32, #tpu.memory_space<vmem>>, vector<1x32xf32>
    %31 = vector.broadcast %30 : vector<1x32xf32> to vector<16x32xf32>
    %32 = arith.mulf %29, %31 : vector<16x32xf32>
    %cst_27 = arith.constant dense<0.000000e+00> : vector<16xf32>
    %33 = vector.multi_reduction <add>, %32, %cst_27 [1] : vector<16x32xf32> to vector<16xf32>
    %34 = vector.shape_cast %33 : vector<16xf32> to vector<16x1xf32>
    %c0_28 = arith.constant 0 : index
    %c0_29 = arith.constant 0 : index
    %35 = vector.load %arg12[%c0_28, %c0_29] : memref<1x1xf32, #tpu.memory_space<vmem>>, vector<1x1xf32>
    %36 = vector.broadcast %35 : vector<1x1xf32> to vector<16x1xf32>
    %37 = arith.addf %34, %36 : vector<16x1xf32>
    %cst_30 = arith.constant 5.000000e-01 : f32
    %38 = vector.broadcast %cst_30 : f32 to vector<16x2xf32>
    %39 = arith.cmpf ogt, %3, %38 : vector<16x2xf32>
    %cst_31 = arith.constant -1.000000e+30 : f32
    %40 = vector.shape_cast %37 : vector<16x1xf32> to vector<16x1xf32>
    %41 = vector.broadcast %40 : vector<16x1xf32> to vector<16x2xf32>
    %42 = vector.broadcast %cst_31 : f32 to vector<16x2xf32>
    %43 = arith.select %39, %41, %42 : vector<16x2xi1>, vector<16x2xf32>
    %cst_32 = arith.constant dense<0xFF800000> : vector<2xf32>
    %44 = vector.multi_reduction <maximumf>, %43, %cst_32 [0] : vector<16x2xf32> to vector<2xf32>
    %45 = vector.shape_cast %44 : vector<2xf32> to vector<1x2xf32>
    %46 = vector.broadcast %45 : vector<1x2xf32> to vector<16x2xf32>
    %47 = arith.mulf %3, %46 : vector<16x2xf32>
    %cst_33 = arith.constant dense<0.000000e+00> : vector<16xf32>
    %48 = vector.multi_reduction <add>, %47, %cst_33 [1] : vector<16x2xf32> to vector<16xf32>
    %49 = vector.shape_cast %48 : vector<16xf32> to vector<16x1xf32>
    %50 = arith.subf %37, %49 : vector<16x1xf32>
    %51 = math.exp %50 : vector<16x1xf32>
    %52 = vector.broadcast %51 : vector<16x1xf32> to vector<16x2xf32>
    %53 = arith.mulf %52, %3 : vector<16x2xf32>
    %cst_34 = arith.constant dense<0.000000e+00> : vector<2xf32>
    %54 = vector.multi_reduction <add>, %53, %cst_34 [0] : vector<16x2xf32> to vector<2xf32>
    %55 = vector.shape_cast %54 : vector<2xf32> to vector<1x2xf32>
    %56 = vector.broadcast %55 : vector<1x2xf32> to vector<16x2xf32>
    %57 = arith.mulf %3, %56 : vector<16x2xf32>
    %cst_35 = arith.constant dense<0.000000e+00> : vector<16xf32>
    %58 = vector.multi_reduction <add>, %57, %cst_35 [1] : vector<16x2xf32> to vector<16xf32>
    %59 = vector.shape_cast %58 : vector<16xf32> to vector<16x1xf32>
    %60 = arith.divf %51, %59 : vector<16x1xf32>
    %61 = vector.broadcast %60 : vector<16x1xf32> to vector<16x32xf32>
    %62 = arith.mulf %61, %0 : vector<16x32xf32>
    %cst_36 = arith.constant dense<0.000000e+00> : vector<2x32xf32>
    %63 = tpu.matmul %2, %62, %cst_36 {dimension_numbers = #tpu.dot_dimension_numbers<[1], [0], [0], [1], [0, 0, 1, 1], [], []>} : vector<2x16xf32>, vector<16x32xf32>, vector<2x32xf32> -> vector<2x32xf32>
    %64 = arith.mulf %63, %63 : vector<2x32xf32>
    %cst_37 = arith.constant dense<0.000000e+00> : vector<2xf32>
    %65 = vector.multi_reduction <add>, %64, %cst_37 [1] : vector<2x32xf32> to vector<2xf32>
    %66 = vector.shape_cast %65 : vector<2xf32> to vector<2x1xf32>
    %67 = math.sqrt %66 : vector<2x1xf32>
    %cst_38 = arith.constant 9.99999993E-9 : f32
    %68 = vector.broadcast %cst_38 : f32 to vector<2x1xf32>
    %69 = arith.addf %67, %68 : vector<2x1xf32>
    %70 = vector.broadcast %69 : vector<2x1xf32> to vector<2x32xf32>
    %71 = arith.divf %63, %70 : vector<2x32xf32>
    %c0_39 = arith.constant 0 : index
    %c0_40 = arith.constant 0 : index
    %72 = vector.load %arg15[%c0_39, %c0_40] : memref<2x32xf32, #tpu.memory_space<vmem>>, vector<2x32xf32>
    tpu.vector_store %arg15[%c0_39, %c0_40], %71 {strides = array<i32>} : memref<2x32xf32, #tpu.memory_space<vmem>>, vector<2x32xf32>,
    return
  }
  func.func @transform_0(%arg0: i32) -> (i32, i32) {
    %c0_i32 = arith.constant 0 : i32
    %c0_i32_0 = arith.constant 0 : i32
    return %arg0, %c0_i32 : i32, i32
  }
  func.func @transform_1(%arg0: i32) -> (i32, i32) {
    %c0_i32 = arith.constant 0 : i32
    %c0_i32_0 = arith.constant 0 : i32
    return %arg0, %c0_i32 : i32, i32
  }
  func.func @transform_2(%arg0: i32) -> (i32, i32) {
    %c0_i32 = arith.constant 0 : i32
    %c0_i32_0 = arith.constant 0 : i32
    %c0_i32_1 = arith.constant 0 : i32
    return %c0_i32, %c0_i32_0 : i32, i32
  }
  func.func @transform_3(%arg0: i32) -> (i32, i32) {
    %c0_i32 = arith.constant 0 : i32
    %c0_i32_0 = arith.constant 0 : i32
    %c0_i32_1 = arith.constant 0 : i32
    return %c0_i32, %c0_i32_0 : i32, i32
  }
  func.func @transform_4(%arg0: i32) -> (i32, i32) {
    %c0_i32 = arith.constant 0 : i32
    %c0_i32_0 = arith.constant 0 : i32
    %c0_i32_1 = arith.constant 0 : i32
    return %c0_i32, %c0_i32_0 : i32, i32
  }
  func.func @transform_5(%arg0: i32) -> (i32, i32) {
    %c0_i32 = arith.constant 0 : i32
    %c0_i32_0 = arith.constant 0 : i32
    %c0_i32_1 = arith.constant 0 : i32
    return %c0_i32, %c0_i32_0 : i32, i32
  }
  func.func @transform_6(%arg0: i32) -> (i32, i32) {
    %c0_i32 = arith.constant 0 : i32
    %c0_i32_0 = arith.constant 0 : i32
    %c0_i32_1 = arith.constant 0 : i32
    return %c0_i32, %c0_i32_0 : i32, i32
  }
  func.func @transform_7(%arg0: i32) -> (i32, i32) {
    %c0_i32 = arith.constant 0 : i32
    %c0_i32_0 = arith.constant 0 : i32
    %c0_i32_1 = arith.constant 0 : i32
    return %c0_i32, %c0_i32_0 : i32, i32
  }
  func.func @transform_8(%arg0: i32) -> (i32, i32) {
    %c0_i32 = arith.constant 0 : i32
    %c0_i32_0 = arith.constant 0 : i32
    %c0_i32_1 = arith.constant 0 : i32
    return %c0_i32, %c0_i32_0 : i32, i32
  }
  func.func @transform_9(%arg0: i32) -> (i32, i32) {
    %c0_i32 = arith.constant 0 : i32
    %c0_i32_0 = arith.constant 0 : i32
    %c0_i32_1 = arith.constant 0 : i32
    return %c0_i32, %c0_i32_0 : i32, i32
  }
  func.func @transform_10(%arg0: i32) -> (i32, i32) {
    %c0_i32 = arith.constant 0 : i32
    %c0_i32_0 = arith.constant 0 : i32
    %c0_i32_1 = arith.constant 0 : i32
    return %c0_i32, %c0_i32_0 : i32, i32
  }
  func.func @transform_11(%arg0: i32) -> (i32, i32) {
    %c0_i32 = arith.constant 0 : i32
    %c0_i32_0 = arith.constant 0 : i32
    %c0_i32_1 = arith.constant 0 : i32
    return %c0_i32, %c0_i32_0 : i32, i32
  }
  func.func @transform_12(%arg0: i32) -> (i32, i32) {
    %c0_i32 = arith.constant 0 : i32
    %c0_i32_0 = arith.constant 0 : i32
    %c0_i32_1 = arith.constant 0 : i32
    return %c0_i32, %c0_i32_0 : i32, i32
  }
  func.func @transform_13(%arg0: i32) -> (i32, i32) {
    %c0_i32 = arith.constant 0 : i32
    %c0_i32_0 = arith.constant 0 : i32
    %c0_i32_1 = arith.constant 0 : i32
    return %c0_i32, %c0_i32_0 : i32, i32
  }
  func.func @transform_14(%arg0: i32) -> (i32, i32) {
    %c0_i32 = arith.constant 0 : i32
    %c0_i32_0 = arith.constant 0 : i32
    return %arg0, %c0_i32 : i32, i32
  }
}

</mosaic_0001>

<bundles_post_ra>
// kernel: tpu_custom_call.1
= control target key start
LH: loop header
LB: loop body
LE: loop exit
PB: predicated region body
PF: predicated region fallthrough
CT: control target
= control target key end

     0   :  { %s1012_s0 = inlined_call_operand.hbm [shape: f32[16,32], index: 0, kind: input, shape index: {}]   ;;  %s1013_s1 = inlined_call_operand.vmem [shape: f32[2,32], index: 1, kind: input, shape index: {}]   ;;  %s1014_s2 = inlined_call_operand.vmem [shape: f32[32,32], index: 2, kind: input, shape index: {}]   ;;  %s1015_s3 = inlined_call_operand.hbm [shape: f32[1,32], index: 3, kind: input, shape index: {}]   ;;  %s1016_s4 = inlined_call_operand.vmem [shape: f32[16,1], index: 4, kind: input, shape index: {}]   ;;  %s1017_s5 = inlined_call_operand.vmem [shape: f32[16,1], index: 5, kind: input, shape index: {}]   ;;  %s1018_s6 = inlined_call_operand.vmem [shape: f32[32,32], index: 6, kind: input, shape index: {}]   ;;  %s1019_s7 = inlined_call_operand.vmem [shape: f32[1,32], index: 7, kind: input, shape index: {}]   ;;  %s1020_s8 = inlined_call_operand.vmem [shape: f32[1,32], index: 8, kind: input, shape index: {}]   ;;  %s1021_s9 = inlined_call_operand.vmem [shape: f32[1,32], index: 9, kind: input, shape index: {}]   ;;  %s1022_s10 = inlined_call_operand.vmem [shape: f32[1,32], index: 10, kind: input, shape index: {}]   ;;  %s1023_s11 = inlined_call_operand.<no memory space> [shape: f32[1,1], index: 11, kind: input, shape index: {}]   ;;  %s1024_s12 = inlined_call_operand.vmem [shape: f32[2,16], index: 12, kind: input, shape index: {}]   ;;  %s1025_s13 = inlined_call_operand.vmem [shape: f32[16,2], index: 13, kind: input, shape index: {}]   ;;  %s1026_s14 = inlined_call_operand.hbm [shape: f32[2,32], index: 14, kind: output, shape index: {}]  }
   0x1   :  { %v19_v0 = vstv %s1023_s11 }
   0x2   :  { %20 = vst [vmem:[#allocation2] sm:$0x1] %v19_v0 }
   0x3   :  { %21 = vsyncpa [#allocation4], 0 }
   0x4   :  { %22 = vsyncpa [#allocation7], 0 }
   0x5   :  { %23 = vsyncpa [#allocation5], 0  ;;  %s788_s15 = smov [#allocation3]   ;;  %s716_s19 = scalar_lea.hbm %s1012_s0, 256 }
   0x6   :  { %s29_s16 = sshll.u32 %s788_s15, 4  ;;  %p717_p0 = scmp.ne.s32.totalorder %s1012_s0, %s716_s19  ;;  %s30_s16 = int_to_ptr.vmem [resolvable:$true] %s29_s16 }
   0x7   :  { %p720_p1 = scmp.lt.u32.totalorder %s716_s19, %s1012_s0 }
   0x9   :  { %p722_p2 = pnand %p720_p1, %p717_p0 }
   0xb   :  { %725 = shalt.err (!%p722_p2)
}
   0xc   :  { %s726_s11 = scalar_lea.vmem %s30_s16, 256  ;;  %p731_p4 = scmp.lt.s32.totalorder %s30_s16, %s30_s16 }
   0xd   :  { %p727_p3 = scmp.ne.s32.totalorder %s30_s16, %s726_s11  ;;  %p732_p5 = scmp.lt.s32.totalorder %s726_s11, %s726_s11 }
   0xf   :  { %p733_p6 = por %p732_p5, %p731_p4 }
  0x11   :  { %p734_p7 = pnand %p733_p6, %p727_p3 }
  0x13   :  { %737 = shalt.err (!%p734_p7)
}
  0x14   :  { %s789_s24 = smov 128   ;;  %s790_s25 = smov 8  }
  0x15   :  { %35 = dma.hbm_to_vmem [thread:$0]  %s1012_s0, 256, %s30_s16, [#allocation4], %s789_s24, %s789_s24, %s790_s25  }
  0x16   :  { %s791_s28 = smov [#allocation6]   ;;  %s738_s17 = scalar_lea.hbm %s1015_s3, 16 }
  0x17   :  { %s46_s29 = sshll.u32 %s791_s28, 4  ;;  %p739_p8 = scmp.ne.s32.totalorder %s1015_s3, %s738_s17  ;;  %s47_s29 = int_to_ptr.vmem [resolvable:$true] %s46_s29 }
  0x18   :  { %p742_p9 = scmp.lt.u32.totalorder %s738_s17, %s1015_s3 }
  0x1a   :  { %p744_p10 = pnand %p742_p9, %p739_p8 }
  0x1c   :  { %747 = shalt.err (!%p744_p10)
}
  0x1d   :  { %s748_s22 = scalar_lea.vmem %s47_s29, 16  ;;  %s752_s0 = scalar_lea.vmem %s47_s29, 32 }
  0x1e   :  { %p749_p11 = scmp.ne.s32.totalorder %s47_s29, %s748_s22  ;;  %p753_p12 = scmp.lt.s32.totalorder %s47_s29, %s47_s29 }
  0x1f   :  { %p754_p13 = scmp.lt.s32.totalorder %s752_s0, %s748_s22 }
  0x21   :  { %p755_p0 = por %p754_p13, %p753_p12 }
  0x23   :  { %p756_p1 = pnand %p755_p0, %p749_p11 }
  0x25   :  { %759 = shalt.err (!%p756_p1)
}
  0x26   :  { %49 = dma.hbm_to_vmem [thread:$0]  %s1015_s3, 16, %s47_s29, [#allocation7]  }
  0x27   :  { %782 = dma.done.wait [#allocation4], 256  }
  0x28   :  { %783 = vsyncadd [#allocation4], 4294967040 }
  0x29   :  { %784 = dma.done.wait [#allocation7], 16  }
  0x2a   :  { %785 = vsyncadd [#allocation7], 4294967280  ;;  %v792_v1 = vmov 0.0|0.0   ;;  %vm793_vm0 = vmmov 0   ;;  %v794_v2 = vmov 0.0   ;;  %v205_v3 = vld [vmem:[%s1018_s6] sm:$0xff] }
  0x2b   :  { %678 = vmatprep.subr.bf16.mxu1 %v792_v1  ;;  %655 = vmatprep.mubr.msk.f32.mxu1 %vm793_vm0, %v794_v2  ;;  %v206_v4 = vld [vmem:[%s1018_s6 + $0x8] sm:$0xff]  ;;  %v207_v5 = vld [vmem:[%s1018_s6 + $0x10] sm:$0xff]  ;;  %v208_v7 = vld [vmem:[%s1018_s6 + $0x18] sm:$0xff]  ;;  %vm93_vm1 = vcmask 261120   ;;  %vm306_vm2 = vcmask 15360   ;;  %v795_v21 = vmov 0  }
  0x2c   :  { %v679_v6 = vpack.c.bf16 %v206_v4, %v205_v3  ;;  %v82_v8 = vld [vmem:[%s1014_s2] sm:$0xff]  ;;  %v83_v9 = vld [vmem:[%s1014_s2 + $0x8] sm:$0xff]  ;;  %v84_v10 = vld [vmem:[%s1014_s2 + $0x10] sm:$0xff]  ;;  %v682_v12 = vpack.c.bf16 %v208_v7, %v207_v5  ;;  %696 = vset.pattern.permute.xlu0 %v795_v21  ;;  %697 = vset.pattern.permute.xlu1 %v795_v21  ;;  %vm313_vm3 = vcmask 1041408   ;;  %vm500_vm6 = vcmask 130048  }
  0x2d   :  { %v85_v11 = vld [vmem:[%s1014_s2 + $0x18] sm:$0xff]  ;;  %v670_v13 = vpack.c.bf16 %v83_v9, %v82_v8  ;;  %v924_v15 = vld [vmem:[#allocation3] sm:$0xff]  ;;  %v933_v17 = vld [vmem:[#allocation3 + $0x8] sm:$0xff]  ;;  %vm575_vm7 = vcmask 254976  }
  0x2e   :  { %680 = vmatpush3.bf16.msra.mxu1 %v679_v6  ;;  %v674_v14 = vpack.c.bf16 %v85_v11, %v84_v10  ;;  %644 = vmatprep.mubr.msk.f32.mxu0 %vm93_vm1, %v924_v15  ;;  %v78_v16 = vld [vmem:[%s1013_s1] sm:$0x3]  ;;  %v176_v22 = vld [vmem:[%s1016_s4 + $0x8] sm:$0xff]  ;;  %v606_v37 = vld [vmem:[#allocation6] ss:$0 sm:$0xff] }
  0x2f   :  { %681 = vmatprep.subr.bf16.mxu1 %v792_v1  ;;  %671 = vmatprep.subr.bf16.mxu0 %v670_v13  ;;  %v940_v18 = vld [vmem:[%s1025_s13] sm:$0xff]  ;;  %v190_v23 = vld [vmem:[%s1017_s5 + $0x8] sm:$0xff] }
  0x30   :  { %673 = vmatpush3.bf16.msra.mxu0 %v670_v13  ;;  %v175_v19 = vld [vmem:[%s1016_s4] sm:$0xff]  ;;  %v968_v33 = vld [vmem:[%s1025_s13 + $0x8] sm:$0xff]  ;;  %vm418_vm5 = vcmp.gt.f32.partialorder %v940_v18, 0.5 }
  0x31   :  { %675 = vmatprep.subr.bf16.mxu0 %v674_v14  ;;  %v189_v20 = vld [vmem:[%s1017_s5] sm:$0xff]  ;;  %179 = vperm.xlu0 %696, %v175_v19   ;;  %vm419_vm4 = vcmp.gt.f32.partialorder %v968_v33, 0.5 }
  0x32   :  { %683 = vmatpush3.bf16.msra.mxu1 %v682_v12  ;;  %193 = vperm.xlu1 %697, %v189_v20   ;;  %v609_v24 = vld [vmem:[%s1019_s7] ss:$0 sm:$0xff] }
  0x33   :  { %684 = vmatprep.subr.bf16.mxu1 %v792_v1  ;;  %v611_v26 = vld [vmem:[%s1020_s8] ss:$0 sm:$0xff] }
  0x34   :  { %677 = vmatpush3.bf16.msra.mxu0 %v674_v14  ;;  %v612_v29 = vld [vmem:[%s1021_s9] ss:$0 sm:$0xff] }
  0x35   :  { %656 = vmatmul.mubr.msk.f32.vlgmr.msra.gmra.mrb[0].mxu1 %vm93_vm1, %v78_v16  ;;  %184 = vperm.xlu0 %696, %v176_v22   ;;  %v616_v49 = vld [vmem:[%s1022_s10] ss:$0 sm:$0xff] }
  0x36   :  { %667 = vmatprep.mubr.msk.f32.mxu1 %vm793_vm0, %v794_v2  ;;  %198 = vperm.xlu1 %697, %v190_v23   ;;  %v617_v58 = vld [vmem:[#allocation2] ss:$0 sm:$0xff] }
  0x37   :  { %645 = vmatmul.mubr.msk.f32.vlgmr.msra.gmra.mrb[0].mxu0 %vm93_vm1, %v933_v17 }
  0x38   :  { %660 = vmatprep.mubr.msk.f32.mxu0 %vm306_vm2, %v940_v18 }
  0xb0   :  { %v180_v36 = vpop.permute.xlu0 %179 }
  0xb1   :  { %v194_v38 = vpop.permute.xlu1 %193 }
  0xb4   :  { %v185_v41 = vpop.permute.xlu0 %184 }
  0xb5   :  { %v199_v44 = vpop.permute.xlu1 %198 }
 0x108   :  { %v285_v25 = vpop.f32.mrb[0].mxu1 }
 0x109   :  { %v286_v27 = vadd.f32 %v609_v24, %v285_v25  ;;  %v657_v28 = vpop.f32.mrb[1].mxu1 }
 0x10a   :  { %v646_v34 = vpop.f32.mrb[0].mxu0 }
 0x10b   :  { %v296_v30 = vmul.f32 %v611_v26, %v286_v27  ;;  %v166_v35 = vpop.f32.mrb[1].mxu0  ;;  %v172_v39 = vadd.f32 %v646_v34, %v606_v37 }
 0x10c   :  { %v167_v40 = vadd.f32 %v606_v37, %v166_v35 }
 0x10d   :  { %v304_v31 = vadd.f32 %v612_v29, %v296_v30  ;;  %v188_v42 = vmul.f32 %v185_v41, %v172_v39 }
 0x10e   :  { %v187_v43 = vmul.f32 %v180_v36, %v167_v40 }
 0x10f   :  { %698 = vtanh.f32 %v304_v31  ;;  %v202_v45 = vadd.f32 %v199_v44, %v188_v42 }
 0x110   :  { %v201_v46 = vadd.f32 %v194_v38, %v187_v43 }
 0x111   :  { %700 = vtanh.f32 %v202_v45 }
 0x112   :  { %702 = vtanh.f32 %v201_v46 }
 0x119   :  { %v699_v32 = vpop.eup %698 }
 0x11a   :  { %658 = vmatprep.subr.msk.mxu0 %vm313_vm3, %v699_v32 }
 0x11b   :  { %659 = vmatpush3.msk.msra.mxu0 %vm313_vm3, %v699_v32  ;;  %v701_v47 = vpop.eup %700 }
 0x11c   :  { %661 = vmatmul.mubr.msk.f32.vlgmr.msra.gmra.mrb[2].mxu0 %vm306_vm2, %v968_v33  ;;  %v703_v50 = vpop.eup %702 }
 0x1ef   :  { %v662_v48 = vpop.f32.mrb[2].mxu0 }
 0x1f0   :  { %v393_v51 = vmul.f32 %v701_v47, %v662_v48  ;;  %v383_v52 = vpop.f32.mrb[3].mxu0 }
 0x1f1   :  { %v392_v53 = vmul.f32 %v703_v50, %v383_v52 }
 0x1f2   :  { %v402_v54 = vmul.f32 %v616_v49, %v393_v51 }
 0x1f3   :  { %v401_v55 = vmul.f32 %v616_v49, %v392_v53 }
 0x1f4   :  { %v406_v56 = vsel %vm93_vm1, %v402_v54, 0.0  ;;  %v79_v54 = vld [vmem:[%s1024_s12] sm:$0x3]  ;;  %s796_s12 = smov [#allocation8]  }
 0x1f5   :  { %407 = vadd.xlane.f32.xlu1 %v406_v56  ;;  %v403_v57 = vsel %vm93_vm1, %v401_v55, 0.0  ;;  %s596_s13 = sshll.u32 %s796_s12, 4  ;;  %s597_s13 = int_to_ptr.vmem [resolvable:$true] %s596_s13 }
 0x1f6   :  { %404 = vadd.xlane.f32.xlu0 %v403_v57  ;;  %s760_s19 = scalar_lea.vmem %s597_s13, 32  ;;  %p765_p3 = scmp.lt.s32.totalorder %s597_s13, %s597_s13 }
 0x1f7   :  { %p761_p2 = scmp.ne.s32.totalorder %s597_s13, %s760_s19  ;;  %p766_p4 = scmp.lt.s32.totalorder %s760_s19, %s760_s19 }
 0x1f9   :  { %p767_p5 = por %p766_p4, %p765_p3 }
 0x1fb   :  { %p768_p6 = pnand %p767_p5, %p761_p2 }
 0x282   :  { %v408_v59 = vpop.xlane.xlu1 %407 }
 0x283   :  { %v417_v60 = vadd.f32 %v617_v58, %v408_v59  ;;  %v405_v61 = vpop.xlane.xlu0 %404 }
 0x284   :  { %v416_v62 = vadd.f32 %v617_v58, %v405_v61 }
 0x285   :  { %427 = vperm.xlu1 %697, %v417_v60  }
 0x286   :  { %422 = vperm.xlu0 %696, %v416_v62  }
 0x304   :  { %v428_v63 = vpop.permute.xlu1 %427 }
 0x305   :  { %v431_v0 = vsel %vm419_vm4, %v428_v63, -1e+30  ;;  %v423_v1 = vpop.permute.xlu0 %422 }
 0x306   :  { %v433_v2 = vsel %vm306_vm2, %v431_v0, -inf  ;;  %v430_v3 = vsel %vm418_vm5, %v423_v1, -1e+30 }
 0x307   :  { %v432_v4 = vsel %vm306_vm2, %v430_v3, -inf }
 0x308   :  { %v434_v5 = vmax.f32 %v432_v4, %v433_v2 }
 0x30a   :  { %v435_v6 = vrot.slane %v434_v5, 4 }
 0x30c   :  { %v436_v7 = vmax.f32 %v434_v5, %v435_v6 }
 0x30e   :  { %v437_v8 = vrot.slane %v436_v7, 2 }
 0x310   :  { %v438_v9 = vmax.f32 %v436_v7, %v437_v8 }
 0x312   :  { %v439_v10 = vrot.slane %v438_v9, 1 }
 0x314   :  { %v440_v11 = vmax.f32 %v438_v9, %v439_v10 }
 0x316   :  { %v442_v12 = vmul.f32 %v440_v11, %v968_v33  ;;  %v441_v13 = vmul.f32 %v440_v11, %v940_v18 }
 0x318   :  { %v446_v14 = vsel %vm306_vm2, %v442_v12, 0.0  ;;  %v443_v16 = vsel %vm306_vm2, %v441_v13, 0.0 }
 0x319   :  { %447 = vadd.xlane.f32.xlu1 %v446_v14  ;;  %444 = vadd.xlane.f32.xlu0 %v443_v16 }
 0x3a6   :  { %v448_v19 = vpop.xlane.xlu1 %447  ;;  %v445_v20 = vpop.xlane.xlu0 %444 }
 0x3a7   :  { %v450_v21 = vsub.f32 %v417_v60, %v448_v19  ;;  %v449_v22 = vsub.f32 %v416_v62, %v445_v20 }
 0x3a9   :  { %v453_v23 = vmul.f32 1.442695, %v450_v21  ;;  %v451_v24 = vmul.f32 1.442695, %v449_v22 }
 0x3ab   :  { %704 = vpow2.f32 %v453_v23 }
 0x3ac   :  { %706 = vpow2.f32 %v451_v24 }
 0x3b5   :  { %v705_v25 = vpop.eup %704 }
 0x3b6   :  { %v707_v26 = vpop.eup %706  ;;  %462 = vperm.xlu1 %697, %v705_v25  }
 0x3b7   :  { %457 = vperm.xlu0 %696, %v707_v26  }
 0x435   :  { %v463_v27 = vpop.permute.xlu1 %462 }
 0x436   :  { %v466_v28 = vmul.f32 %v463_v27, %v968_v33  ;;  %v458_v29 = vpop.permute.xlu0 %457 }
 0x437   :  { %v465_v30 = vmul.f32 %v458_v29, %v940_v18 }
 0x438   :  { %v468_v31 = vsel %vm306_vm2, %v466_v28, 0.0 }
 0x439   :  { %v467_v32 = vsel %vm306_vm2, %v465_v30, 0.0 }
 0x43a   :  { %v469_v34 = vadd.f32 %v468_v31, %v467_v32 }
 0x43c   :  { %v470_v35 = vrot.slane %v469_v34, 4 }
 0x43e   :  { %v471_v36 = vadd.f32 %v470_v35, %v469_v34 }
 0x440   :  { %v472_v37 = vrot.slane %v471_v36, 2 }
 0x442   :  { %v473_v38 = vadd.f32 %v472_v37, %v471_v36 }
 0x444   :  { %v474_v39 = vrot.slane %v473_v38, 1 }
 0x446   :  { %v475_v40 = vadd.f32 %v474_v39, %v473_v38 }
 0x448   :  { %v477_v41 = vmul.f32 %v475_v40, %v968_v33  ;;  %v476_v42 = vmul.f32 %v475_v40, %v940_v18 }
 0x44a   :  { %v481_v43 = vsel %vm306_vm2, %v477_v41, 0.0  ;;  %v478_v44 = vsel %vm306_vm2, %v476_v42, 0.0 }
 0x44b   :  { %482 = vadd.xlane.f32.xlu1 %v481_v43  ;;  %479 = vadd.xlane.f32.xlu0 %v478_v44 }
 0x4d8   :  { %v483_v45 = vpop.xlane.xlu1 %482  ;;  %v480_v46 = vpop.xlane.xlu0 %479 }
 0x4d9   :  { %708 = vrcp.f32 %v483_v45 }
 0x4da   :  { %710 = vrcp.f32 %v480_v46 }
 0x4e3   :  { %v709_v47 = vpop.eup %708 }
 0x4e4   :  { %v711_v48 = vpop.eup %710  ;;  %v487_v49 = vmul.f32 %v709_v47, %v705_v25 }
 0x4e5   :  { %v485_v50 = vmul.f32 %v711_v48, %v707_v26 }
 0x4e6   :  { %495 = vperm.xlu1 %697, %v487_v49  }
 0x4e7   :  { %490 = vperm.xlu0 %696, %v485_v50  }
 0x565   :  { %v496_v51 = vpop.permute.xlu1 %495 }
 0x566   :  { %v499_v33 = vmul.f32 %v496_v51, %v933_v17  ;;  %v491_v18 = vpop.permute.xlu0 %490 }
 0x567   :  { %v498_v52 = vmul.f32 %v491_v18, %v924_v15 }
 0x569   :  { %v685_v53 = vpack.c.bf16 %v499_v33, %v498_v52 }
 0x56b   :  { %686 = vmatpush3.bf16.msra.mxu1 %v685_v53 }
 0x56e   :  { %668 = vmatmul.mubr.msk.f32.vlgmr.msra.gmra.mrb[2].mxu1 %vm500_vm6, %v79_v54 }
 0x641   :  { %v570_v55 = vpop.f32.mrb[2].mxu1 }
 0x642   :  { %v574_v56 = vmul.f32 %v570_v55, %v570_v55  ;;  %v669_v57 = vpop.f32.mrb[3].mxu1 }
 0x644   :  { %v576_v58 = vsel %vm575_vm7, %v574_v56, 0.0 }
 0x645   :  { %577 = vadd.xlane.f32.xlu0 %v576_v58 }
 0x6d2   :  { %v578_v59 = vpop.xlane.xlu0 %577 }
 0x6d3   :  { %712 = vrsqrt.f32 %v578_v59  ;;  %vm581_vm8 = vcmp.eq.f32.partialorder %v578_v59, inf  ;;  %v584_v15 = vand.u32 2147483648, %v578_v59  ;;  %vm583_vm9 = vcmp.eq.f32.partialorder %v578_v59, 0.0 }
 0x6dd   :  { %v713_v17 = vpop.eup %712 }
 0x6de   :  { %v580_v60 = vmul.f32 %v713_v17, %v578_v59 }
 0x6e0   :  { %v582_v61 = vsel %vm581_vm8, %v578_v59, %v580_v60 }
 0x6e1   :  { %v585_v62 = vsel %vm583_vm9, %v584_v15, %v582_v61 }
 0x6e2   :  { %v586_v63 = vadd.f32 1e-08, %v585_v62 }
 0x6e4   :  { %714 = vrcp.f32 %v586_v63 }
 0x6ee   :  { %v715_v0 = vpop.eup %714 }
 0x6ef   :  { %v588_v1 = vmul.f32 %v715_v0, %v570_v55 }
 0x6f1   :  { %589 = vst.msk [vmem:[#allocation8] sm:$0x3] %vm575_vm7, %v588_v1 }
 0x6f2   :  { %771 = shalt.err (!%p768_p6)
}
 0x6f3   :  { %s772_s22 = scalar_lea.hbm %s1026_s14, 32 }
 0x6f4   :  { %p773_p7 = scmp.ne.s32.totalorder %s1026_s14, %s772_s22  ;;  %p776_p8 = scmp.lt.u32.totalorder %s772_s22, %s1026_s14 }
 0x6f6   :  { %p778_p9 = pnand %p776_p8, %p773_p7 }
 0x6f8   :  { %781 = shalt.err (!%p778_p9)
}
 0x6f9   :  { %599 = dma.vmem_to_hbm [thread:$0]  %s597_s13, 32, %s1026_s14, [#allocation5]  }
 0x6fa   :  { %786 = dma.done.wait [#allocation5], 32  }
 0x6fb   :  { %787 = vsyncadd [#allocation5], 4294967264 }
 0x6fc   :  { %603 = vsyncpa [#allocation4], 1 }
 0x6fd   :  { %604 = vsyncpa [#allocation7], 1 }
 0x6fe   :  { %605 = vsyncpa [#allocation5], 1 }

</bundles_post_ra>
